<compile_context>
chip_gen: v7x
topology: tpu7x:2x2x1
jax: 0.10.0
libtpu: 0.0.40
codegen_flags: <defaults>
</compile_context>

<pallas_src>
import jax
import jax.numpy as jnp
from jax.experimental import pallas as pl
from jax.experimental.pallas import tpu as pltpu


def _round_up(x, m):
    return ((x + m - 1) // m) * m


def _tpu_vmem_capacity_bytes():
    try:
        return int(pltpu.get_tpu_info().vmem_capacity_bytes)
    except Exception:
        return 64 * 1024 * 1024  # conservative (v7x-sized) fallback


def _budgets():
    """(tile VMEM budget, vmem_limit_bytes) chosen per TPU generation."""
    cap = _tpu_vmem_capacity_bytes()
    if cap >= 100 * 1024 * 1024:                 # v5e / v6e: 128 MiB VMEM
        return 48 * 1024 * 1024, 96 * 1024 * 1024
    return 24 * 1024 * 1024, 48 * 1024 * 1024    # v7x: 64 MiB VMEM


# ---------------------------------------------------------------------------
# Pallas kernel: one (tile x tile) block of the SQUARED pairwise distance
# matrix, accumulated over the K (feature) grid axis.
#   D2[i, j] = ||x_i||^2 + ||x_j||^2 - 2 * x_i . x_j
# (No sqrt here: sqrt is monotonic, so all argmin / top-k downstream are
#  unchanged; sqrt is applied only to the O(n) gathered values.)
# ---------------------------------------------------------------------------
def _sqdist_kernel(x_ref, y_ref, xnorm_ref, ynorm_ref, out_ref):
    @pl.when(pl.program_id(2) == 0)
    def _():
        # (tile,1) + (1,tile) broadcast -> (tile,tile) init of the resident block.
        out_ref[...] = xnorm_ref[...] + ynorm_ref[...]
    # MXU matmul with f32 accumulation; (1,1)-contraction == x @ y.T (trans_b).
    out_ref[...] -= 2.0 * jax.lax.dot_general(
        x_ref[...], y_ref[...],
        dimension_numbers=(((1,), (1,)), ((), ())),
        preferred_element_type=jnp.float32)


def _pick_mn_tile(n):
    """Row/col tile: biggest MXU-friendly tile without excessive padding."""
    n128 = _round_up(max(n, 1), 128)
    if n128 <= 512:
        return n128                       # single (i, j) tile, zero waste
    cands = (512, 384, 256)               # never collapse to 128 on big batches
    pads = [_round_up(n128, t) for t in cands]
    for t, p in zip(cands, pads):
        if p <= int(1.15 * n128):         # <= ~15% padded rows: take biggest
            return t
    return max(zip([-p for p in pads], cands))[1]   # least padding, prefer big


def _pick_k_tile(tile, d, budget_bytes):
    """K tile (feature axis), sized so the double-buffered VMEM fits budget."""
    d128 = _round_up(max(d, 1), 128)
    # f32 bytes: 2 inputs x double-buffered (tile, tk) + double-buffered
    # (tile, tile) output block + tiny norm slivers.
    max_tk = (budget_bytes // 4 - 2 * tile * tile - 8 * tile) // (4 * tile)
    max_tk = max(128, (max_tk // 128) * 128)
    return min(d128, max_tk)


def pairwise_sqdist(x):
    """Pairwise SQUARED Euclidean distances via the Pallas kernel. x: (n, d)."""
    n, d = x.shape
    budget, vmem_limit = _budgets()
    tile = _pick_mn_tile(n)
    tk = _pick_k_tile(tile, d, budget)
    n_pad = _round_up(max(n, 1), tile)
    d_pad = _round_up(max(d, 1), tk)

    xp = jnp.zeros((n_pad, d_pad), jnp.float32).at[:n, :d].set(
        x.astype(jnp.float32))
    sq = jnp.sum(xp * xp, axis=1)                # (n_pad,)  padded rows -> 0
    xnorm = sq[:, None]                          # (n_pad, 1) row-norm column
    ynorm = sq[None, :]                          # (1, n_pad) col-norm row

    grid = (n_pad // tile, n_pad // tile, d_pad // tk)

    d2_pad = pl.pallas_call(
        _sqdist_kernel,
        out_shape=jax.ShapeDtypeStruct((n_pad, n_pad), jnp.float32),
        grid_spec=pltpu.PrefetchScalarGridSpec(
            num_scalar_prefetch=0,
            grid=grid,
            in_specs=[
                pl.BlockSpec((tile, tk), lambda i, j, k: (i, k)),   # x rows
                pl.BlockSpec((tile, tk), lambda i, j, k: (j, k)),   # x cols
                # Norm blocks: index depends only on i / j, so they are only
                # re-fetched when that grid index changes (k is innermost).
                pl.BlockSpec((tile, 1), lambda i, j, k: (i, 0)),
                pl.BlockSpec((1, tile), lambda i, j, k: (0, j)),
            ],
            out_specs=pl.BlockSpec((tile, tile), lambda i, j, k: (i, j)),
        ),
        compiler_params=pltpu.CompilerParams(
            # Independent (i, j) output tiles -> megacore-shardable; K is the
            # accumulation axis (output resident), hence "arbitrary" and last.
            dimension_semantics=("parallel", "parallel", "arbitrary"),
            vmem_limit_bytes=vmem_limit,
        ),
    )(xp, xp, xnorm, ynorm)
    return d2_pad[:n, :n]


# ---------------------------------------------------------------------------
# Forward pass of RobustTripletLoss_final on top of the Pallas-computed
# squared-distance matrix.
# ---------------------------------------------------------------------------
def robust_triplet_loss_final(inputs, prediction, targets, true_targets, prob,
                              threshold, *, margin, key):
    """Returns (loss, correct, cnt). loss == 0.0 when no anchor is confident
    (the PyTorch cnt == 0 branch). `true_targets` is accepted for signature
    parity but, exactly as in the PyTorch forward, never used."""
    del true_targets
    n = inputs.shape[0]
    f32 = jnp.float32
    rows = jnp.arange(n)

    d2 = pairwise_sqdist(inputs)                 # (n, n) SQUARED distances

    def gather_dist(idx):
        # sqrt only on the O(n) gathered entries (clamp mirrors torch's 1e-12).
        return jnp.sqrt(jnp.maximum(d2[rows, idx], 1e-12))

    tgt = targets.astype(jnp.int32)
    prob = prob.astype(f32)
    eye = jnp.eye(n, dtype=bool)
    same = tgt[:, None] == tgt[None, :]
    is_pos = same & ~eye                 # positives excluding the anchor itself
    is_neg = ~same
    is_conf = prob >= threshold

    # TODO(synk): the PyTorch module draws positives with host-side
    # np.random.choice and bounded re-sampling `while` loops; reproduced with
    # jax.random (uniform-among-mask via random-argmax), not bit-identical RNG.
    k1, k2 = jax.random.split(key)

    # Random positive (uniform over positives != anchor).
    u1 = jax.random.uniform(k1, (n, n))
    rand_pos = jnp.argmax(jnp.where(is_pos, u1, -1.0), axis=1)

    # Hardest negative + the at-most-11 replacement candidates the PyTorch
    # while-loop can ever examine: top-k instead of a full O(n^2 log n) argsort.
    big = f32(1e30)
    neg_d2 = jnp.where(is_neg, d2, big)
    ncand = max(1, min(11, n - 1))
    k_top = min(n, ncand + 1)
    _, neg_order = jax.lax.top_k(-neg_d2, k_top)   # ascending-distance ranks
    hard_neg = neg_order[:, 0]

    d_ap0 = gather_dist(rand_pos)
    d_an0 = gather_dist(hard_neg)

    pos_conf = prob[rand_pos] >= threshold
    neg_conf = prob[hard_neg] >= threshold
    pred_cls = jnp.argmax(prediction, axis=1).astype(jnp.int32)
    is_fn = pred_cls[hard_neg] == tgt    # hardest negative looks like a false negative

    # Replacement negative: first *confident* negative among distance ranks
    # 1..11 (else the last examined rank), mirroring the bounded while-loop.
    cand_cols = k_top - 1
    cand_idx = neg_order[:, 1:1 + cand_cols]
    cand_ranks = jnp.arange(1, 1 + cand_cols)
    num_neg = jnp.sum(is_neg, axis=1)
    cand_ok = (prob[cand_idx] >= threshold) & (cand_ranks[None, :] < num_neg[:, None])
    has_ok = jnp.any(cand_ok, axis=1)
    fallback_rank = jnp.clip(jnp.minimum(cand_cols, num_neg - 1), 0, k_top - 1)
    new_rank = jnp.where(has_ok, 1 + jnp.argmax(cand_ok, axis=1), fallback_rank)
    hard_neg_new = jnp.take_along_axis(neg_order, new_rank[:, None], axis=1)[:, 0]
    d_an_new = gather_dist(hard_neg_new)

    # Replacement positive: uniform over *confident* positives != anchor
    # (falls back to any positive when none is confident, like the bounded retry).
    conf_pos = is_pos & is_conf[None, :]
    has_conf_pos = jnp.any(conf_pos, axis=1)
    sel_mask = jnp.where(has_conf_pos[:, None], conf_pos, is_pos)
    u2 = jax.random.uniform(k2, (n, n))
    rand_pos_new = jnp.argmax(jnp.where(sel_mask, u2, -1.0), axis=1)
    d_ap_new = gather_dist(rand_pos_new)

    # Per-anchor case selection (same branch structure as the module).
    avg = 0.5 * (d_ap0 + d_an0)
    fix_neg = pos_conf & (~neg_conf) & is_fn
    fix_pos = ((~pos_conf) & neg_conf) | ((~pos_conf) & (~neg_conf) & (~is_fn))
    inverse = (~pos_conf) & (~neg_conf) & is_fn

    d_ap = jnp.where(fix_neg, avg, jnp.where(fix_pos, d_ap_new, d_ap0))
    d_an = jnp.where(fix_neg, d_an_new, jnp.where(fix_pos, avg, d_an0))

    raw = jnp.where(inverse, d_an - d_ap, d_ap - d_an) + f32(margin)
    per_anchor = jnp.maximum(raw, 0.0)

    w = is_conf.astype(f32)
    cnt = jnp.sum(w)
    loss = jnp.where(cnt > 0,
                     jnp.sum(per_anchor * w) / jnp.maximum(cnt, 1.0),
                     f32(0.0))
    correct = jnp.sum(((d_an >= d_ap) & is_conf).astype(jnp.int32))
    return loss, correct, cnt.astype(jnp.int32)


def _ref_pairwise_dist(x):
    x = x.astype(jnp.float32)
    sq = jnp.sum(x * x, axis=1)
    g = jnp.dot(x, x.T, precision=jax.lax.Precision.HIGHEST)
    d2 = sq[:, None] + sq[None, :] - 2.0 * g
    return jnp.sqrt(jnp.maximum(d2, 1e-12))


if __name__ == "__main__":
    key = jax.random.PRNGKey(0)
    k_in, k_pred, k_prob, k_sel, k_big = jax.random.split(key, 5)

    n, d, num_classes = 8, 32, 4
    margin, threshold = 0.3, 0.5

    inputs = jax.random.normal(k_in, (n, d), dtype=jnp.float32)
    prediction = jax.random.normal(k_pred, (n, num_classes), dtype=jnp.float32)
    targets = jnp.array([0, 0, 1, 1, 2, 2, 3, 3], dtype=jnp.int32)
    true_targets = targets
    prob = jax.random.uniform(k_prob, (n,), dtype=jnp.float32)

    # Check the Pallas squared-distance kernel against a pure-JAX reference
    # (off-diagonal only; the near-zero diagonal is excluded by the algorithm).
    offdiag = ~jnp.eye(n, dtype=bool)
    dist_pl = jnp.sqrt(jnp.maximum(pairwise_sqdist(inputs), 1e-12))
    dist_ref = _ref_pairwise_dist(inputs)
    assert jnp.allclose(jnp.where(offdiag, dist_pl, 0.0),
                        jnp.where(offdiag, dist_ref, 0.0),
                        rtol=2e-3, atol=2e-3), "pairwise distance mismatch"

    # Second, slightly larger check exercising tile padding (tile > 128).
    n2, d2_ = 300, 200
    x_big = jax.random.normal(k_big, (n2, d2_), dtype=jnp.float32)
    off2 = ~jnp.eye(n2, dtype=bool)
    dist_pl2 = jnp.sqrt(jnp.maximum(pairwise_sqdist(x_big), 1e-12))
    dist_ref2 = _ref_pairwise_dist(x_big)
    assert jnp.allclose(jnp.where(off2, dist_pl2, 0.0),
                        jnp.where(off2, dist_ref2, 0.0),
                        rtol=2e-3, atol=2e-3), "pairwise distance mismatch (big)"

    # Full forward pass.
    loss, correct, cnt = robust_triplet_loss_final(
        inputs, prediction, targets, true_targets, prob, threshold,
        margin=margin, key=k_sel)
    jax.block_until_ready((loss, correct, cnt))
    print("KERNEL_OK")
</pallas_src>

<mosaic_0001>
module attributes {stable_mosaic.version = 11 : i64} {
  func.func @_sqdist_kernel(%arg0: i32, %arg1: i32, %arg2: i32, %arg3: memref<128x128xf32, #tpu.memory_space<vmem>>, %arg4: memref<128x128xf32, #tpu.memory_space<vmem>>, %arg5: memref<128x1xf32, #tpu.memory_space<vmem>>, %arg6: memref<1x128xf32, #tpu.memory_space<vmem>>, %arg7: memref<128x128xf32, #tpu.memory_space<vmem>>) attributes {dimension_semantics = [#tpu.dimension_semantics<parallel>, #tpu.dimension_semantics<parallel>, #tpu.dimension_semantics<arbitrary>], iteration_bounds = array<i64: 1, 1, 1>, scalar_prefetch = 0 : i64, scratch_operands = 0 : i64, tpu.core_type = #tpu.core_type<tc>, window_params = [{transform_indices = @transform_0, window_bounds = array<i64: 128, 128>}, {transform_indices = @transform_1, window_bounds = array<i64: 128, 128>}, {transform_indices = @transform_2, window_bounds = array<i64: 128, 1>}, {transform_indices = @transform_3, window_bounds = array<i64: 1, 128>}, {transform_indices = @transform_4, window_bounds = array<i64: 128, 128>}]} {
    %c0_i32 = arith.constant 0 : i32
    %0 = arith.cmpi eq, %arg2, %c0_i32 : i32
    %1 = arith.extui %0 : i1 to i32
    %c0_i32_0 = arith.constant 0 : i32
    %2 = arith.cmpi ne, %1, %c0_i32_0 : i32
    scf.if %2 {
      %c0_9 = arith.constant 0 : index
      %c0_10 = arith.constant 0 : index
      %11 = vector.load %arg5[%c0_9, %c0_10] : memref<128x1xf32, #tpu.memory_space<vmem>>, vector<128x1xf32>
      %c0_11 = arith.constant 0 : index
      %c0_12 = arith.constant 0 : index
      %12 = vector.load %arg6[%c0_11, %c0_12] : memref<1x128xf32, #tpu.memory_space<vmem>>, vector<1x128xf32>
      %13 = vector.broadcast %11 : vector<128x1xf32> to vector<128x128xf32>
      %14 = vector.broadcast %12 : vector<1x128xf32> to vector<128x128xf32>
      %15 = arith.addf %13, %14 : vector<128x128xf32>
      %c0_13 = arith.constant 0 : index
      %c0_14 = arith.constant 0 : index
      %16 = vector.load %arg7[%c0_13, %c0_14] : memref<128x128xf32, #tpu.memory_space<vmem>>, vector<128x128xf32>
      tpu.vector_store %arg7[%c0_13, %c0_14], %15 {strides = array<i32>} : memref<128x128xf32, #tpu.memory_space<vmem>>, vector<128x128xf32>,
    } else {
    }
    %c0 = arith.constant 0 : index
    %c0_1 = arith.constant 0 : index
    %3 = vector.load %arg7[%c0, %c0_1] : memref<128x128xf32, #tpu.memory_space<vmem>>, vector<128x128xf32>
    %c0_2 = arith.constant 0 : index
    %c0_3 = arith.constant 0 : index
    %4 = vector.load %arg3[%c0_2, %c0_3] : memref<128x128xf32, #tpu.memory_space<vmem>>, vector<128x128xf32>
    %c0_4 = arith.constant 0 : index
    %c0_5 = arith.constant 0 : index
    %5 = vector.load %arg4[%c0_4, %c0_5] : memref<128x128xf32, #tpu.memory_space<vmem>>, vector<128x128xf32>
    %cst = arith.constant dense<0.000000e+00> : vector<128x128xf32>
    %6 = tpu.matmul %4, %5, %cst {dimension_numbers = #tpu.dot_dimension_numbers<[1], [1], [0], [0], [0, 0, 1, 0], [], []>} : vector<128x128xf32>, vector<128x128xf32>, vector<128x128xf32> -> vector<128x128xf32>
    %cst_6 = arith.constant 2.000000e+00 : f32
    %7 = vector.broadcast %cst_6 : f32 to vector<128x128xf32>
    %8 = arith.mulf %7, %6 : vector<128x128xf32>
    %9 = arith.subf %3, %8 : vector<128x128xf32>
    %c0_7 = arith.constant 0 : index
    %c0_8 = arith.constant 0 : index
    %10 = vector.load %arg7[%c0_7, %c0_8] : memref<128x128xf32, #tpu.memory_space<vmem>>, vector<128x128xf32>
    tpu.vector_store %arg7[%c0_7, %c0_8], %9 {strides = array<i32>} : memref<128x128xf32, #tpu.memory_space<vmem>>, vector<128x128xf32>,
    return
  }
  func.func @transform_0(%arg0: i32, %arg1: i32, %arg2: i32) -> (i32, i32) {
    %c0_i32 = arith.constant 0 : i32
    return %arg0, %arg2 : i32, i32
  }
  func.func @transform_1(%arg0: i32, %arg1: i32, %arg2: i32) -> (i32, i32) {
    %c0_i32 = arith.constant 0 : i32
    return %arg1, %arg2 : i32, i32
  }
  func.func @transform_2(%arg0: i32, %arg1: i32, %arg2: i32) -> (i32, i32) {
    %c0_i32 = arith.constant 0 : i32
    %c0_i32_0 = arith.constant 0 : i32
    return %arg0, %c0_i32 : i32, i32
  }
  func.func @transform_3(%arg0: i32, %arg1: i32, %arg2: i32) -> (i32, i32) {
    %c0_i32 = arith.constant 0 : i32
    %c0_i32_0 = arith.constant 0 : i32
    return %c0_i32, %arg1 : i32, i32
  }
  func.func @transform_4(%arg0: i32, %arg1: i32, %arg2: i32) -> (i32, i32) {
    %c0_i32 = arith.constant 0 : i32
    return %arg0, %arg1 : i32, i32
  }
}

</mosaic_0001>

<bundles_post_ra>
// kernel: tpu_custom_call.1
= control target key start
LH: loop header
LB: loop body
LE: loop exit
PB: predicated region body
PF: predicated region fallthrough
CT: control target
= control target key end

     0   :  { %9 = vsyncpa [#allocation3], 0  ;;  %s804_s0 = inlined_call_operand.vmem [shape: f32[128,128], index: 0, kind: input, shape index: {}]   ;;  %s805_s1 = inlined_call_operand.hbm [shape: f32[128,128], index: 1, kind: input, shape index: {}]   ;;  %s806_s2 = inlined_call_operand.vmem [shape: f32[128,1], index: 2, kind: input, shape index: {}]   ;;  %s807_s3 = inlined_call_operand.vmem [shape: f32[1,128], index: 3, kind: input, shape index: {}]   ;;  %s808_s4 = inlined_call_operand.hbm [shape: f32[128,128], index: 4, kind: output, shape index: {}]  }
   0x1   :  { %10 = vsyncpa [#allocation4], 0  ;;  %s621_s15 = smov [#allocation2]   ;;  %s573_s19 = scalar_lea.hbm %s805_s1, 2048 }
   0x2   :  { %s18_s16 = sshll.u32 %s621_s15, 4  ;;  %p574_p0 = scmp.ne.s32.totalorder %s805_s1, %s573_s19  ;;  %s19_s16 = int_to_ptr.vmem [resolvable:$true] %s18_s16 }
   0x3   :  { %p577_p1 = scmp.lt.u32.totalorder %s573_s19, %s805_s1 }
   0x5   :  { %p579_p2 = pnand %p577_p1, %p574_p0 }
   0x7   :  { %582 = shalt.err (!%p579_p2)
}
   0x8   :  { %s583_s24 = scalar_lea.vmem %s19_s16, 2048  ;;  %p588_p4 = scmp.lt.s32.totalorder %s19_s16, %s19_s16 }
   0x9   :  { %p584_p3 = scmp.ne.s32.totalorder %s19_s16, %s583_s24  ;;  %p589_p5 = scmp.lt.s32.totalorder %s583_s24, %s583_s24 }
   0xb   :  { %p590_p6 = por %p589_p5, %p588_p4 }
   0xd   :  { %p591_p7 = pnand %p590_p6, %p584_p3 }
   0xf   :  { %594 = shalt.err (!%p591_p7)
}
  0x10   :  { %s622_s25 = smov 128   ;;  %s623_s26 = smov 8  }
  0x11   :  { %24 = dma.hbm_to_vmem [thread:$0]  %s805_s1, 2048, %s19_s16, [#allocation3], %s622_s25, %s622_s25, %s623_s26  }
  0x12   :  { %617 = dma.done.wait [#allocation3], 2048  }
  0x13   :  { %618 = vsyncadd [#allocation3], 4294965248  ;;  %v624_v0 = vmov 0   ;;  %v203_v1 = vld [vmem:[#allocation2] sm:$0xff]  ;;  %v204_v2 = vld [vmem:[#allocation2 + $0x8] sm:$0xff] }
  0x14   :  { %572 = vset.pattern.permute.xlu1 %v624_v0  ;;  %571 = vset.pattern.permute.xlu0 %v624_v0  ;;  %v205_v3 = vld [vmem:[#allocation2 + $0x10] sm:$0xff]  ;;  %v518_v4 = vpack.c.bf16 %v204_v2, %v203_v1  ;;  %v206_v5 = vld [vmem:[#allocation2 + $0x18] sm:$0xff]  ;;  %v187_v7 = vld [vmem:[%s804_s0] sm:$0xff] }
  0x15   :  { %v522_v6 = vpack.c.bf16 %v206_v5, %v205_v3  ;;  %v195_v8 = vld [vmem:[%s804_s0 + $0x40] sm:$0xff]  ;;  %v208_v10 = vld [vmem:[#allocation2 + $0x28] sm:$0xff]  ;;  %494 = vmatprep.mubr.f32.mxu0 %v187_v7  ;;  %v38_v12 = vld [vmem:[%s806_s2 + $0x10] sm:$0xff] }
  0x16   :  { %519 = vmatprep.subr.bf16.mxu0 %v518_v4  ;;  %550 = vmatprep.subr.bf16.mxu1 %v518_v4  ;;  %v207_v9 = vld [vmem:[#allocation2 + $0x20] sm:$0xff]  ;;  %v39_v14 = vld [vmem:[%s806_s2 + $0x18] sm:$0xff]  ;;  %v209_v15 = vld [vmem:[#allocation2 + $0x30] sm:$0xff] }
  0x17   :  { %521 = vmatpush3.bf16.xpose.msra.mxu0 %v518_v4  ;;  %558 = vmatpush3.bf16.xpose.msra.mxu1 %v518_v4  ;;  %v526_v11 = vpack.c.bf16 %v208_v10, %v207_v9  ;;  %v36_v13 = vld [vmem:[%s806_s2] sm:$0xff]  ;;  %v210_v16 = vld [vmem:[#allocation2 + $0x38] sm:$0xff]  ;;  %v37_v17 = vld [vmem:[%s806_s2 + $0x8] sm:$0xff] }
  0x18   :  { %523 = vmatprep.subr.bf16.mxu0 %v522_v6  ;;  %551 = vmatprep.subr.bf16.mxu1 %v522_v6  ;;  %v41_v18 = vld [vmem:[%s806_s2 + $0x28] sm:$0xff]  ;;  %v530_v19 = vpack.c.bf16 %v210_v16, %v209_v15  ;;  %v40_v20 = vld [vmem:[%s806_s2 + $0x20] sm:$0xff]  ;;  %v43_v21 = vld [vmem:[%s806_s2 + $0x38] sm:$0xff] }
  0x19   :  { %506 = vmatprep.mubr.f32.mxu1 %v195_v8  ;;  %65 = vperm.xlu1 %572, %v38_v12   ;;  %v211_v22 = vld [vmem:[#allocation2 + $0x40] sm:$0xff]  ;;  %v212_v23 = vld [vmem:[#allocation2 + $0x48] sm:$0xff]  ;;  %v42_v24 = vld [vmem:[%s806_s2 + $0x30] sm:$0xff] }
  0x1a   :  { %55 = vperm.xlu0 %571, %v36_v13   ;;  %v45_v25 = vld [vmem:[%s806_s2 + $0x48] sm:$0xff]  ;;  %v534_v26 = vpack.c.bf16 %v212_v23, %v211_v22  ;;  %v44_v27 = vld [vmem:[%s806_s2 + $0x40] sm:$0xff]  ;;  %v47_v28 = vld [vmem:[%s806_s2 + $0x58] sm:$0xff] }
  0x1b   :  { %v213_v29 = vld [vmem:[#allocation2 + $0x50] sm:$0xff]  ;;  %v214_v30 = vld [vmem:[#allocation2 + $0x58] sm:$0xff]  ;;  %v49_v32 = vld [vmem:[%s806_s2 + $0x68] sm:$0xff] }
  0x1c   :  { %v46_v31 = vld [vmem:[%s806_s2 + $0x50] sm:$0xff]  ;;  %v538_v33 = vpack.c.bf16 %v214_v30, %v213_v29  ;;  %v48_v34 = vld [vmem:[%s806_s2 + $0x60] sm:$0xff]  ;;  %v51_v35 = vld [vmem:[%s806_s2 + $0x78] sm:$0xff] }
  0x1d   :  { %70 = vperm.xlu1 %572, %v39_v14   ;;  %v215_v36 = vld [vmem:[#allocation2 + $0x60] sm:$0xff]  ;;  %v216_v37 = vld [vmem:[#allocation2 + $0x68] sm:$0xff]  ;;  %v50_v38 = vld [vmem:[%s806_s2 + $0x70] sm:$0xff] }
  0x1e   :  { %60 = vperm.xlu0 %571, %v37_v17   ;;  %v542_v39 = vpack.c.bf16 %v216_v37, %v215_v36  ;;  %v217_v40 = vld [vmem:[#allocation2 + $0x70] sm:$0xff]  ;;  %v218_v41 = vld [vmem:[#allocation2 + $0x78] sm:$0xff]  ;;  %v188_v43 = vld [vmem:[%s804_s0 + $0x8] sm:$0xff] }
  0x1f   :  { %525 = vmatpush3.bf16.xpose.msra.mxu0 %v522_v6  ;;  %559 = vmatpush3.bf16.xpose.msra.mxu1 %v522_v6  ;;  %v546_v42 = vpack.c.bf16 %v218_v41, %v217_v40  ;;  %v196_v44 = vld [vmem:[%s804_s0 + $0x48] sm:$0xff]  ;;  %v189_v45 = vld [vmem:[%s804_s0 + $0x10] sm:$0xff]  ;;  %v190_v47 = vld [vmem:[%s804_s0 + $0x18] sm:$0xff] }
  0x20   :  { %527 = vmatprep.subr.bf16.mxu0 %v526_v11  ;;  %552 = vmatprep.subr.bf16.mxu1 %v526_v11  ;;  %v197_v46 = vld [vmem:[%s804_s0 + $0x50] sm:$0xff]  ;;  %v198_v48 = vld [vmem:[%s804_s0 + $0x58] sm:$0xff]  ;;  %v191_v49 = vld [vmem:[%s804_s0 + $0x20] sm:$0xff] }
  0x21   :  { %80 = vperm.xlu1 %572, %v41_v18   ;;  %v199_v50 = vld [vmem:[%s804_s0 + $0x60] sm:$0xff]  ;;  %v192_v51 = vld [vmem:[%s804_s0 + $0x28] sm:$0xff]  ;;  %v193_v53 = vld [vmem:[%s804_s0 + $0x30] sm:$0xff] }
  0x22   :  { %75 = vperm.xlu0 %571, %v40_v20   ;;  %v200_v52 = vld [vmem:[%s804_s0 + $0x68] sm:$0xff]  ;;  %v201_v54 = vld [vmem:[%s804_s0 + $0x70] sm:$0xff]  ;;  %v194_v55 = vld [vmem:[%s804_s0 + $0x38] sm:$0xff] }
  0x23   :  { %v202_v56 = vld [vmem:[%s804_s0 + $0x78] sm:$0xff]  ;;  %v769_v5 = vld [vmem:[%s807_s3] ss:$0 sm:$0xff]  ;;  %s625_s0 = smov [#allocation5]  }
  0x24   :  { %s417_s3 = sshll.u32 %s625_s0, 4  ;;  %s418_s3 = int_to_ptr.vmem [resolvable:$true] %s417_s3 }
  0x25   :  { %90 = vperm.xlu1 %572, %v43_v21   ;;  %s595_s16 = scalar_lea.vmem %s418_s3, 2048  ;;  %p600_p9 = scmp.lt.s32.totalorder %s418_s3, %s418_s3 }
  0x26   :  { %85 = vperm.xlu0 %571, %v42_v24   ;;  %p596_p8 = scmp.ne.s32.totalorder %s418_s3, %s595_s16  ;;  %p601_p10 = scmp.lt.s32.totalorder %s595_s16, %s595_s16 }
  0x27   :  { %529 = vmatpush3.bf16.xpose.msra.mxu0 %v526_v11  ;;  %560 = vmatpush3.bf16.xpose.msra.mxu1 %v526_v11 }
  0x28   :  { %531 = vmatprep.subr.bf16.mxu0 %v530_v19  ;;  %553 = vmatprep.subr.bf16.mxu1 %v530_v19  ;;  %p602_p11 = por %p601_p10, %p600_p9 }
  0x29   :  { %100 = vperm.xlu1 %572, %v45_v25  }
  0x2a   :  { %95 = vperm.xlu0 %571, %v44_v27   ;;  %p603_p12 = pnand %p602_p11, %p596_p8 }
  0x2d   :  { %110 = vperm.xlu1 %572, %v47_v28  }
  0x2e   :  { %105 = vperm.xlu0 %571, %v46_v31  }
  0x2f   :  { %533 = vmatpush3.bf16.xpose.msra.mxu0 %v530_v19  ;;  %561 = vmatpush3.bf16.xpose.msra.mxu1 %v530_v19 }
  0x30   :  { %535 = vmatprep.subr.bf16.mxu0 %v534_v26  ;;  %554 = vmatprep.subr.bf16.mxu1 %v534_v26 }
  0x31   :  { %120 = vperm.xlu1 %572, %v49_v32  }
  0x32   :  { %115 = vperm.xlu0 %571, %v48_v34  }
  0x35   :  { %130 = vperm.xlu1 %572, %v51_v35  }
  0x36   :  { %125 = vperm.xlu0 %571, %v50_v38  }
  0x37   :  { %537 = vmatpush3.bf16.xpose.msra.mxu0 %v534_v26  ;;  %562 = vmatpush3.bf16.xpose.msra.mxu1 %v534_v26 }
  0x38   :  { %539 = vmatprep.subr.bf16.mxu0 %v538_v33  ;;  %555 = vmatprep.subr.bf16.mxu1 %v538_v33 }
  0x3f   :  { %541 = vmatpush3.bf16.xpose.msra.mxu0 %v538_v33  ;;  %563 = vmatpush3.bf16.xpose.msra.mxu1 %v538_v33 }
  0x40   :  { %543 = vmatprep.subr.bf16.mxu0 %v542_v39  ;;  %556 = vmatprep.subr.bf16.mxu1 %v542_v39 }
  0x47   :  { %545 = vmatpush3.bf16.xpose.msra.mxu0 %v542_v39  ;;  %564 = vmatpush3.bf16.xpose.msra.mxu1 %v542_v39 }
  0x48   :  { %547 = vmatprep.subr.bf16.mxu0 %v546_v42  ;;  %557 = vmatprep.subr.bf16.mxu1 %v546_v42 }
  0x4f   :  { %549 = vmatpush3.bf16.xpose.msra.mxu0 %v546_v42  ;;  %565 = vmatpush3.bf16.xpose.msra.mxu1 %v546_v42 }
  0x56   :  { %495 = vmatmul.mubr.f32.vlgmr.msra.gmra.mrb[0].mxu0 %v188_v43  ;;  %507 = vmatmul.mubr.f32.vlgmr.msra.gmra.mrb[0].mxu1 %v196_v44 }
  0x57   :  { %497 = vmatprep.mubr.f32.mxu0 %v189_v45  ;;  %509 = vmatprep.mubr.f32.mxu1 %v197_v46 }
  0x5a   :  { %498 = vmatmul.mubr.f32.gmra.mrb[2].mxu0 %v190_v47  ;;  %510 = vmatmul.mubr.f32.gmra.mrb[2].mxu1 %v198_v48 }
  0x5b   :  { %500 = vmatprep.mubr.f32.mxu0 %v191_v49  ;;  %512 = vmatprep.mubr.f32.mxu1 %v199_v50 }
  0x5e   :  { %501 = vmatmul.mubr.f32.gmra.mrb[4].mxu0 %v192_v51  ;;  %513 = vmatmul.mubr.f32.gmra.mrb[4].mxu1 %v200_v52 }
  0x5f   :  { %503 = vmatprep.mubr.f32.mxu0 %v193_v53  ;;  %515 = vmatprep.mubr.f32.mxu1 %v201_v54 }
  0x62   :  { %504 = vmatmul.mubr.f32.gmra.mrb[6].mxu0 %v194_v55  ;;  %516 = vmatmul.mubr.f32.gmra.mrb[6].mxu1 %v202_v56 }
  0x98   :  { %v66_v57 = vpop.permute.xlu1 %65 }
  0x99   :  { %v56_v58 = vpop.permute.xlu0 %55  ;;  %v141_v32 = vadd.f32 %v769_v5, %v66_v57 }
  0x9a   :  { %v139_v14 = vadd.f32 %v769_v5, %v56_v58 }
  0x9c   :  { %v71_v59 = vpop.permute.xlu1 %70 }
  0x9d   :  { %v61_v60 = vpop.permute.xlu0 %60  ;;  %v142_v26 = vadd.f32 %v769_v5, %v71_v59 }
  0x9e   :  { %v140_v8 = vadd.f32 %v769_v5, %v61_v60 }
  0xa0   :  { %v81_v61 = vpop.permute.xlu1 %80 }
  0xa1   :  { %v76_v62 = vpop.permute.xlu0 %75  ;;  %v144_v42 = vadd.f32 %v769_v5, %v81_v61 }
  0xa2   :  { %v143_v48 = vadd.f32 %v769_v5, %v76_v62 }
  0xa4   :  { %v762_v63 = vpop.permute.xlu1 %90 }
  0xa5   :  { %v764_v0 = vpop.permute.xlu0 %85  ;;  %v146_v60 = vadd.f32 %v769_v5, %v762_v63 }
  0xa8   :  { %v101_v1 = vpop.permute.xlu1 %100 }
  0xa9   :  { %v96_v2 = vpop.permute.xlu0 %95  ;;  %v148_v9 = vadd.f32 %v769_v5, %v101_v1 }
  0xaa   :  { %v147_v15 = vadd.f32 %v769_v5, %v96_v2 }
  0xac   :  { %v111_v3 = vpop.permute.xlu1 %110 }
  0xad   :  { %v106_v4 = vpop.permute.xlu0 %105  ;;  %v150_v27 = vadd.f32 %v769_v5, %v111_v3 }
  0xae   :  { %v149_v33 = vadd.f32 %v769_v5, %v106_v4  ;;  %v145_v4 = vadd.f32 %v769_v5, %v764_v0 }
  0xb0   :  { %v121_v18 = vpop.permute.xlu1 %120 }
  0xb1   :  { %v116_v19 = vpop.permute.xlu0 %115  ;;  %v152_v43 = vadd.f32 %v769_v5, %v121_v18 }
  0xb2   :  { %v151_v49 = vadd.f32 %v769_v5, %v116_v19 }
  0xb4   :  { %v131_v50 = vpop.permute.xlu1 %130 }
  0xb5   :  { %v126_v53 = vpop.permute.xlu0 %125  ;;  %v154_v61 = vadd.f32 %v769_v5, %v131_v50 }
 0x129   :  { %v496_v6 = vpop.f32.mrb[0].mxu0  ;;  %v508_v7 = vpop.f32.mrb[0].mxu1 }
 0x12a   :  { %v365_v10 = vmul.f32 2.0, %v496_v6  ;;  %v373_v11 = vmul.f32 2.0, %v508_v7  ;;  %v285_v12 = vpop.f32.mrb[1].mxu0  ;;  %v325_v13 = vpop.f32.mrb[1].mxu1  ;;  %v153_v6 = vadd.f32 %v769_v5, %v126_v53 }
 0x12b   :  { %v364_v16 = vmul.f32 2.0, %v285_v12  ;;  %v372_v17 = vmul.f32 2.0, %v325_v13 }
 0x12c   :  { %v381_v20 = vsub.f32 %v140_v8, %v365_v10  ;;  %v389_v21 = vsub.f32 %v148_v9, %v373_v11 }
 0x12d   :  { %v380_v22 = vsub.f32 %v139_v14, %v364_v16  ;;  %v388_v23 = vsub.f32 %v147_v15, %v372_v17  ;;  %v499_v24 = vpop.f32.mrb[2].mxu0  ;;  %v511_v25 = vpop.f32.mrb[2].mxu1 }
 0x12e   :  { %397 = vst [vmem:[#allocation5 + $0x8] sm:$0xff] %v381_v20  ;;  %405 = vst [vmem:[#allocation5 + $0x48] sm:$0xff] %v389_v21  ;;  %v367_v28 = vmul.f32 2.0, %v499_v24  ;;  %v375_v29 = vmul.f32 2.0, %v511_v25  ;;  %v295_v30 = vpop.f32.mrb[3].mxu0  ;;  %v335_v31 = vpop.f32.mrb[3].mxu1 }
 0x12f   :  { %396 = vst [vmem:[#allocation5] sm:$0xff] %v380_v22  ;;  %404 = vst [vmem:[#allocation5 + $0x40] sm:$0xff] %v388_v23  ;;  %v366_v34 = vmul.f32 2.0, %v295_v30  ;;  %v374_v35 = vmul.f32 2.0, %v335_v31 }
 0x130   :  { %v383_v36 = vsub.f32 %v142_v26, %v367_v28  ;;  %v391_v37 = vsub.f32 %v150_v27, %v375_v29 }
 0x131   :  { %v382_v38 = vsub.f32 %v141_v32, %v366_v34  ;;  %v390_v39 = vsub.f32 %v149_v33, %v374_v35  ;;  %v502_v40 = vpop.f32.mrb[4].mxu0  ;;  %v514_v41 = vpop.f32.mrb[4].mxu1 }
 0x132   :  { %399 = vst [vmem:[#allocation5 + $0x18] sm:$0xff] %v383_v36  ;;  %407 = vst [vmem:[#allocation5 + $0x58] sm:$0xff] %v391_v37  ;;  %v369_v44 = vmul.f32 2.0, %v502_v40  ;;  %v377_v45 = vmul.f32 2.0, %v514_v41  ;;  %v305_v46 = vpop.f32.mrb[5].mxu0  ;;  %v345_v47 = vpop.f32.mrb[5].mxu1 }
 0x133   :  { %398 = vst [vmem:[#allocation5 + $0x10] sm:$0xff] %v382_v38  ;;  %406 = vst [vmem:[#allocation5 + $0x50] sm:$0xff] %v390_v39  ;;  %v368_v51 = vmul.f32 2.0, %v305_v46  ;;  %v376_v52 = vmul.f32 2.0, %v345_v47 }
 0x134   :  { %v385_v54 = vsub.f32 %v144_v42, %v369_v44  ;;  %v393_v55 = vsub.f32 %v152_v43, %v377_v45 }
 0x135   :  { %v384_v56 = vsub.f32 %v143_v48, %v368_v51  ;;  %v392_v57 = vsub.f32 %v151_v49, %v376_v52  ;;  %v505_v58 = vpop.f32.mrb[6].mxu0  ;;  %v517_v59 = vpop.f32.mrb[6].mxu1 }
 0x136   :  { %401 = vst [vmem:[#allocation5 + $0x28] sm:$0xff] %v385_v54  ;;  %409 = vst [vmem:[#allocation5 + $0x68] sm:$0xff] %v393_v55  ;;  %v371_v62 = vmul.f32 2.0, %v505_v58  ;;  %v379_v1 = vmul.f32 2.0, %v517_v59  ;;  %v315_v2 = vpop.f32.mrb[7].mxu0  ;;  %v355_v3 = vpop.f32.mrb[7].mxu1 }
 0x137   :  { %400 = vst [vmem:[#allocation5 + $0x20] sm:$0xff] %v384_v56  ;;  %408 = vst [vmem:[#allocation5 + $0x60] sm:$0xff] %v392_v57  ;;  %v370_v7 = vmul.f32 2.0, %v315_v2  ;;  %v378_v8 = vmul.f32 2.0, %v355_v3 }
 0x138   :  { %v387_v63 = vsub.f32 %v146_v60, %v371_v62  ;;  %v395_v9 = vsub.f32 %v154_v61, %v379_v1 }
 0x139   :  { %v386_v10 = vsub.f32 %v145_v4, %v370_v7  ;;  %v394_v11 = vsub.f32 %v153_v6, %v378_v8 }
 0x13a   :  { %403 = vst [vmem:[#allocation5 + $0x38] sm:$0xff] %v387_v63  ;;  %411 = vst [vmem:[#allocation5 + $0x78] sm:$0xff] %v395_v9 }
 0x13b   :  { %402 = vst [vmem:[#allocation5 + $0x30] sm:$0xff] %v386_v10  ;;  %410 = vst [vmem:[#allocation5 + $0x70] sm:$0xff] %v394_v11 }
 0x13c   :  { %606 = shalt.err (!%p603_p12)
}
 0x13d   :  { %s607_s19 = scalar_lea.hbm %s808_s4, 2048 }
 0x13e   :  { %p608_p13 = scmp.ne.s32.totalorder %s808_s4, %s607_s19  ;;  %p611_p0 = scmp.lt.u32.totalorder %s607_s19, %s808_s4 }
 0x140   :  { %p613_p1 = pnand %p611_p0, %p608_p13 }
 0x142   :  { %616 = shalt.err (!%p613_p1)
}
 0x143   :  { %423 = dma.vmem_to_hbm [thread:$0]  %s418_s3, 2048, %s808_s4, [#allocation4], %s622_s25, %s622_s25, %s623_s26  }
 0x144   :  { %619 = dma.done.wait [#allocation4], 2048  }
 0x145   :  { %620 = vsyncadd [#allocation4], 4294965248 }
 0x146   :  { %427 = vsyncpa [#allocation3], 1 }
 0x147   :  { %428 = vsyncpa [#allocation4], 1 }

</bundles_post_ra>
